<compile_context>
chip_gen: v5e
topology: v5e:2x2
jax: 0.10.0
libtpu: 0.0.40
codegen_flags: <defaults>
</compile_context>

<pallas_src>
import jax
import jax.numpy as jnp
from jax import lax
from jax.experimental import pallas as pl
from jax.experimental.pallas import tpu as pltpu


# ----------------------------------------------------------------------------
# Kernel 1: adaptive support + node-adaptive weights & bias (runs once).
# ----------------------------------------------------------------------------
def dgcn_prep_kernel(x0_ref, e1_ref, e2_ref,
                     fc0_w_ref, fc0_b_ref, fc1_wt_ref, fc1_b_ref,
                     fc2_wt_ref, fc2_b_ref,
                     wp_ref, bp_ref,
                     sup_ref, w_ref, bias_ref):
    f32 = jnp.float32

    # ---- temporal MLP:  m = mlp(x[0])  (module semantics: only batch 0) ----
    x0 = x0_ref[...]                                   # (Cin, N, S)
    w0 = fc0_w_ref[...]                                # (1, S)
    # fc0: Linear(S, 1) == weighted reduction over the sequence axis (run-once, tiny).
    h = jnp.sum(x0 * w0[None, :, :], axis=-1) + fc0_b_ref[...]            # (Cin, N)
    h = jnp.tanh(h)
    # fc1: Linear(N, D)
    h = jnp.dot(h, fc1_wt_ref[...], preferred_element_type=f32) + fc1_b_ref[...]   # (Cin, D)
    h = jnp.tanh(h)
    # transpose(1,0) + fc2: Linear(Cin, D) -> contract Cin without explicit transpose
    m = lax.dot_general(h, fc2_wt_ref[...], (((0,), (0,)), ((), ())),
                        preferred_element_type=f32) + fc2_b_ref[...]      # (D, D)
    m = jnp.tanh(m)

    # ---- adaptive support: softmax(relu(E1 @ m @ E2^T), dim=1) ----
    e1 = e1_ref[...]                                   # (N, D)
    e2 = e2_ref[...]                                   # (N, D)
    tmp = jnp.dot(e1, m, preferred_element_type=f32)                       # (N, D)
    logits = lax.dot_general(tmp, e2, (((1,), (1,)), ((), ())),
                             preferred_element_type=f32)                   # (N, N)
    logits = jnp.maximum(logits, 0.0)
    logits = logits - jnp.max(logits, axis=1, keepdims=True)
    ex = jnp.exp(logits)
    # EXACT reciprocal (review fix): rows must sum to 1; runs once, approx buys nothing.
    support = ex / jnp.sum(ex, axis=1, keepdims=True)
    # bf16: the graph-mixing matmuls in kernel 2 run on the MXU in bf16 (intentional).
    sup_ref[...] = support.astype(sup_ref.dtype)

    # ---- node-adaptive weights & bias via ONE concatenated matmul (review opt) ----
    #   W[:, c*Cout+o] = sum_d E1[:,d]*Wp1[d, c*Cout+o] + E2[:,d]*Wp2[d, c*Cout+o]
    E = jnp.concatenate([e1, e2], axis=1)                                  # (N, 2D)
    w_flat = jnp.dot(E, wp_ref[...], preferred_element_type=f32)           # (N, C*Cout)
    cout = w_ref.shape[2]
    for c in range(w_ref.shape[0]):
        w_ref[c] = w_flat[:, c * cout:(c + 1) * cout]                      # (N, Cout) plane
    bias_ref[...] = jnp.dot(E, bp_ref[...], preferred_element_type=f32)    # (N, Cout)


# ----------------------------------------------------------------------------
# Kernel 2: gridded, pipelined graph convolution (hot path, HBM-bound).
# ----------------------------------------------------------------------------
def dgcn_gconv_kernel(sup_ref, w_ref, b_ref, x_ref, o_ref):
    # sup_ref : (N, N)        bf16  adaptive support            (resident)
    # w_ref   : (C, N, Cout)  f32   node-adaptive weights       (resident), C = (k+1)*Cin
    # b_ref   : (N, Cout)     f32   node-adaptive bias          (resident)
    # x_ref   : (Cin, N, T)   f32   input tile, native layout   (streamed; leading B squeezed)
    # o_ref   : (Cout, N, T)  f32   output tile, final layout   (streamed; leading B squeezed)
    f32 = jnp.float32
    cin, n, t = x_ref.shape
    cout = o_ref.shape[0]
    c_total = w_ref.shape[0]
    k1 = c_total // cin                               # k + 1 Chebyshev levels

    sup = sup_ref[...]                                # (N, N) bf16
    bias = b_ref[...]                                 # (N, Cout) f32

    # All Cin channels stacked on the lane axis: one slab -> one MXU dot per level.
    h_cat = jnp.concatenate([x_ref[i] for i in range(cin)], axis=1)   # (N, Cin*T) f32

    # Lane-dense accumulators, one per output channel (final layout, no transpose).
    accs = [jnp.zeros((n, t), f32) for _ in range(cout)]

    for kk in range(k1):
        # Fused (k, Cin) contraction: consume this power level immediately (no scratch).
        for i in range(cin):
            wc = w_ref[kk * cin + i]                  # (N, Cout) f32 plane
            h_i = h_cat[:, i * t:(i + 1) * t]         # (N, T), slice at 128-lane boundary
            for o in range(cout):
                # (N,1) lane-broadcast x (N,T): VPU FMA
                accs[o] = accs[o] + wc[:, o:o + 1] * h_i
        # Recursive Chebyshev propagation for the next level: ONE batched bf16 MXU dot
        # over all Cin channels (identity power never multiplied).
        if kk + 1 < k1:
            h_cat = jnp.dot(sup, h_cat.astype(jnp.bfloat16),
                            preferred_element_type=f32)                  # (N, Cin*T) f32

    # Bias add + unmasked lane-dense stores straight into the final (B,Cout,N,S) layout.
    for o in range(cout):
        o_ref[o] = (accs[o] + bias[:, o:o + 1]).astype(o_ref.dtype)


# ----------------------------------------------------------------------------
# Tile selection / VMEM accounting (review fixes: no double counting, grid >= 2)
# ----------------------------------------------------------------------------
def _choose_s_tile(S, B, cin, n, cout, budget_bytes=16 << 20, min_grid=2):
    """Largest multiple-of-128 tile of S that divides S and whose double-buffered
    streamed tiles (x + out, f32) fit the budget, preferring >= min_grid total grid
    steps so BlockSpec double-buffering / megacore sharding stay alive."""
    if S % 128 != 0:
        return S                                      # full-dim block (always legal)
    cands = [c for c in range(128, S + 1, 128) if S % c == 0]

    def need(c):                                      # 2x = double buffer, once
        return 2 * (cin * n * c + cout * n * c) * 4

    fitting = [c for c in cands if need(c) <= budget_bytes] or [128]
    pipelined = [c for c in fitting if B * (S // c) >= min_grid]
    return max(pipelined) if pipelined else max(fitting)


def dgcn_forward(x, e1, e2, params, *, k, s_tile=None):
    """Full-path DGCN forward (woT=woV=woS=False), eval-mode dropout."""
    B, Cin, N, S = x.shape
    D = e1.shape[1]
    Cout = params["bp1"].shape[1]
    C = (k + 1) * Cin

    # ---- run-once parameter packing (kilobytes, wrapper-side) ----
    wp_cat = jnp.concatenate([params["wp1"].reshape(D, C * Cout),
                              params["wp2"].reshape(D, C * Cout)], axis=0)   # (2D, C*Cout)
    bp_cat = jnp.concatenate([params["bp1"], params["bp2"]], axis=0)         # (2D, Cout)
    x0 = x[0]                                      # (Cin, N, S): only x[0] feeds the MLP

    vmem = pl.BlockSpec(memory_space=pltpu.MemorySpace.VMEM)

    # ---- kernel 1: support (bf16) + node-adaptive weights / bias (already (C,N,Cout)) ----
    support, w_cno, bias = pl.pallas_call(
        dgcn_prep_kernel,
        out_shape=(jax.ShapeDtypeStruct((N, N), jnp.bfloat16),
                   jax.ShapeDtypeStruct((C, N, Cout), jnp.float32),
                   jax.ShapeDtypeStruct((N, Cout), jnp.float32)),
        in_specs=[vmem] * 11,
        out_specs=(vmem, vmem, vmem),
    )(x0, e1, e2,
      params["fc0_w"], params["fc0_b"], params["fc1_wt"], params["fc1_b"],
      params["fc2_wt"], params["fc2_b"], wp_cat, bp_cat)

    # ---- kernel 2: grid over (batch, seq tiles); x and out in their native layouts ----
    if s_tile is None:
        s_tile = _choose_s_tile(S, B, Cin, N, Cout)
    assert S % s_tile == 0, (S, s_tile)
    grid = (B, S // s_tile)

    # VMEM accounting (no double counting): 2x only on the streamed tiles.
    x_tile = Cin * N * s_tile * 4
    o_tile = Cout * N * s_tile * 4
    resident = (N * max(N, 128) * 2          # support, bf16 (lane padded)
                + C * N * 128 * 4            # weights (Cout lane-padded)
                + N * 128 * 4)               # bias (lane-padded)
    need = 2 * (x_tile + o_tile) + resident
    vmem_limit = int(min(48 << 20, max(16 << 20, 2 * need)))   # v7x-safe cap, margin for scratch

    out = pl.pallas_call(
        dgcn_gconv_kernel,
        out_shape=jax.ShapeDtypeStruct((B, Cout, N, S), jnp.float32),
        grid_spec=pltpu.PrefetchScalarGridSpec(
            num_scalar_prefetch=0,
            grid=grid,
            in_specs=[
                pl.BlockSpec((N, N), lambda b, t: (0, 0)),                    # support  (resident)
                pl.BlockSpec((C, N, Cout), lambda b, t: (0, 0, 0)),           # weights  (resident)
                pl.BlockSpec((N, Cout), lambda b, t: (0, 0)),                 # bias     (resident)
                pl.BlockSpec((None, Cin, N, s_tile), lambda b, t: (b, 0, 0, t)),  # x tile (streamed)
            ],
            out_specs=pl.BlockSpec((None, Cout, N, s_tile), lambda b, t: (b, 0, 0, t)),
        ),
        compiler_params=pltpu.CompilerParams(
            dimension_semantics=("parallel", "parallel"),   # megacore sharding on v7x
            vmem_limit_bytes=vmem_limit,
        ),
    )(support, w_cno, bias, x)

    return out                                   # (B, Cout, N, S) == permute(0, 3, 2, 1)


# ----------------------------------------------------------------------------
# Pure-JAX reference mirroring the PyTorch forward (eval mode, f32).
# ----------------------------------------------------------------------------
def dgcn_reference(x, e1, e2, params, *, k):
    B, Cin, N, S = x.shape
    x0 = x[0]
    h = jnp.einsum('cns,s->cn', x0, params["fc0_w"][0]) + params["fc0_b"][0, 0]
    h = jnp.tanh(h)
    h = h @ params["fc1_wt"] + params["fc1_b"][0]
    h = jnp.tanh(h)
    h = h.T
    m = h @ params["fc2_wt"] + params["fc2_b"][0]
    m = jnp.tanh(m)

    support = jax.nn.softmax(jax.nn.relu((e1 @ m) @ e2.T), axis=1)
    sup_list = [jnp.eye(N, dtype=x.dtype)]
    for _ in range(k):
        sup_list.append(sup_list[-1] @ support)
    supports = jnp.stack(sup_list, axis=0)

    x_g = jnp.einsum('knm,bims->bknis', supports, x)
    weights = (jnp.einsum('nd,dkio->nkio', e1, params["wp1"])
               + jnp.einsum('nd,dkio->nkio', e2, params["wp2"]))
    x_gconv = jnp.einsum('bknis,nkio->bsno', x_g, weights)
    bias = e1 @ params["bp1"] + e2 @ params["bp2"]
    x_gconv = x_gconv + bias
    return jnp.transpose(x_gconv, (0, 3, 2, 1))


if __name__ == "__main__":
    # small shapes consistent with the module; S chosen so the lane axis is 128-dense
    # and the (B, S-tiles) grid has >= 2 steps.
    B, Cin, Cout = 2, 4, 8
    N, S, D, K = 16, 128, 8, 2          # node_num, input_len, embed_dim, k
    dropout_rate = 0.1                   # unused in eval mode

    key = jax.random.PRNGKey(0)
    keys = jax.random.split(key, 13)

    x = jax.random.normal(keys[0], (B, Cin, N, S), jnp.float32)
    e1 = jax.random.normal(keys[1], (N, D), jnp.float32) * 0.5
    e2 = jax.random.normal(keys[2], (N, D), jnp.float32) * 0.5

    params = {
        # fc0: Linear(S, 1)
        "fc0_w": jax.random.normal(keys[3], (1, S), jnp.float32) * 0.1,
        "fc0_b": jax.random.normal(keys[4], (1, 1), jnp.float32) * 0.1,
        # fc1: Linear(N, D)   (stored pre-transposed: (N, D))
        "fc1_wt": jax.random.normal(keys[5], (N, D), jnp.float32) * 0.3,
        "fc1_b": jax.random.normal(keys[6], (1, D), jnp.float32) * 0.1,
        # fc2: Linear(Cin, D) (stored pre-transposed: (Cin, D))
        "fc2_wt": jax.random.normal(keys[7], (Cin, D), jnp.float32) * 0.3,
        "fc2_b": jax.random.normal(keys[8], (1, D), jnp.float32) * 0.1,
        # weight / bias pools
        "wp1": jax.random.normal(keys[9], (D, K + 1, Cin, Cout), jnp.float32) * 0.2,
        "wp2": jax.random.normal(keys[10], (D, K + 1, Cin, Cout), jnp.float32) * 0.2,
        "bp1": jax.random.normal(keys[11], (D, Cout), jnp.float32) * 0.2,
        "bp2": jax.random.normal(keys[12], (D, Cout), jnp.float32) * 0.2,
    }

    # s_tile=128 -> grid (2, 1): two pipelined / megacore-shardable steps.
    out = dgcn_forward(x, e1, e2, params, k=K, s_tile=128)
    out = jax.block_until_ready(out)

    ref = dgcn_reference(x, e1, e2, params, k=K)
    ref = jax.block_until_ready(ref)

    assert out.shape == (B, Cout, N, S), out.shape
    # graph-mixing matmuls run in bf16 (f32 accumulation) -> widened tolerance vs f32 ref
    if not jnp.allclose(out, ref, atol=3e-2, rtol=3e-2):
        max_err = float(jnp.max(jnp.abs(out - ref)))
        raise AssertionError(f"kernel mismatch vs reference, max abs err={max_err}")

    print("KERNEL_OK")
</pallas_src>

<mosaic_0001>
module attributes {stable_mosaic.version = 11 : i64} {
  func.func @dgcn_prep_kernel(%arg0: memref<4x16x128xf32, #tpu.memory_space<vmem>>, %arg1: memref<16x8xf32, #tpu.memory_space<vmem>>, %arg2: memref<16x8xf32, #tpu.memory_space<vmem>>, %arg3: memref<1x128xf32, #tpu.memory_space<vmem>>, %arg4: memref<1x1xf32, #tpu.memory_space<vmem>>, %arg5: memref<16x8xf32, #tpu.memory_space<vmem>>, %arg6: memref<1x8xf32, #tpu.memory_space<vmem>>, %arg7: memref<4x8xf32, #tpu.memory_space<vmem>>, %arg8: memref<1x8xf32, #tpu.memory_space<vmem>>, %arg9: memref<16x96xf32, #tpu.memory_space<vmem>>, %arg10: memref<16x8xf32, #tpu.memory_space<vmem>>, %arg11: memref<16x16xbf16, #tpu.memory_space<vmem>>, %arg12: memref<12x16x8xf32, #tpu.memory_space<vmem>>, %arg13: memref<16x8xf32, #tpu.memory_space<vmem>>) attributes {dimension_semantics = [], scalar_prefetch = 0 : i64, scratch_operands = 0 : i64, tpu.core_type = #tpu.core_type<tc>} {
    %c0 = arith.constant 0 : index
    %c0_0 = arith.constant 0 : index
    %c0_1 = arith.constant 0 : index
    %0 = vector.load %arg0[%c0, %c0_0, %c0_1] : memref<4x16x128xf32, #tpu.memory_space<vmem>>, vector<4x16x128xf32>
    %c0_2 = arith.constant 0 : index
    %c0_3 = arith.constant 0 : index
    %1 = vector.load %arg3[%c0_2, %c0_3] : memref<1x128xf32, #tpu.memory_space<vmem>>, vector<1x128xf32>
    %2 = vector.shape_cast %1 : vector<1x128xf32> to vector<1x1x128xf32>
    %3 = vector.broadcast %2 : vector<1x1x128xf32> to vector<4x16x128xf32>
    %4 = arith.mulf %0, %3 : vector<4x16x128xf32>
    %cst = arith.constant dense<0.000000e+00> : vector<4x16xf32>
    %5 = vector.multi_reduction <add>, %4, %cst [2] : vector<4x16x128xf32> to vector<4x16xf32>
    %c0_4 = arith.constant 0 : index
    %c0_5 = arith.constant 0 : index
    %6 = vector.load %arg4[%c0_4, %c0_5] : memref<1x1xf32, #tpu.memory_space<vmem>>, vector<1x1xf32>
    %7 = vector.broadcast %6 : vector<1x1xf32> to vector<4x16xf32>
    %8 = arith.addf %5, %7 : vector<4x16xf32>
    %9 = math.tanh %8 : vector<4x16xf32>
    %c0_6 = arith.constant 0 : index
    %c0_7 = arith.constant 0 : index
    %10 = vector.load %arg5[%c0_6, %c0_7] : memref<16x8xf32, #tpu.memory_space<vmem>>, vector<16x8xf32>
    %cst_8 = arith.constant dense<0.000000e+00> : vector<4x8xf32>
    %11 = tpu.matmul %9, %10, %cst_8 {dimension_numbers = #tpu.dot_dimension_numbers<[1], [0], [0], [1], [0, 0, 1, 1], [], []>} : vector<4x16xf32>, vector<16x8xf32>, vector<4x8xf32> -> vector<4x8xf32>
    %c0_9 = arith.constant 0 : index
    %c0_10 = arith.constant 0 : index
    %12 = vector.load %arg6[%c0_9, %c0_10] : memref<1x8xf32, #tpu.memory_space<vmem>>, vector<1x8xf32>
    %13 = vector.broadcast %12 : vector<1x8xf32> to vector<4x8xf32>
    %14 = arith.addf %11, %13 : vector<4x8xf32>
    %15 = math.tanh %14 : vector<4x8xf32>
    %c0_11 = arith.constant 0 : index
    %c0_12 = arith.constant 0 : index
    %16 = vector.load %arg7[%c0_11, %c0_12] : memref<4x8xf32, #tpu.memory_space<vmem>>, vector<4x8xf32>
    %cst_13 = arith.constant dense<0.000000e+00> : vector<8x8xf32>
    %17 = tpu.matmul %15, %16, %cst_13 {dimension_numbers = #tpu.dot_dimension_numbers<[0], [0], [1], [1], [0, 1, 1, 1], [], []>} : vector<4x8xf32>, vector<4x8xf32>, vector<8x8xf32> -> vector<8x8xf32>
    %c0_14 = arith.constant 0 : index
    %c0_15 = arith.constant 0 : index
    %18 = vector.load %arg8[%c0_14, %c0_15] : memref<1x8xf32, #tpu.memory_space<vmem>>, vector<1x8xf32>
    %19 = vector.broadcast %18 : vector<1x8xf32> to vector<8x8xf32>
    %20 = arith.addf %17, %19 : vector<8x8xf32>
    %21 = math.tanh %20 : vector<8x8xf32>
    %c0_16 = arith.constant 0 : index
    %c0_17 = arith.constant 0 : index
    %22 = vector.load %arg1[%c0_16, %c0_17] : memref<16x8xf32, #tpu.memory_space<vmem>>, vector<16x8xf32>
    %c0_18 = arith.constant 0 : index
    %c0_19 = arith.constant 0 : index
    %23 = vector.load %arg2[%c0_18, %c0_19] : memref<16x8xf32, #tpu.memory_space<vmem>>, vector<16x8xf32>
    %cst_20 = arith.constant dense<0.000000e+00> : vector<16x8xf32>
    %24 = tpu.matmul %22, %21, %cst_20 {dimension_numbers = #tpu.dot_dimension_numbers<[1], [0], [0], [1], [0, 0, 1, 1], [], []>} : vector<16x8xf32>, vector<8x8xf32>, vector<16x8xf32> -> vector<16x8xf32>
    %cst_21 = arith.constant dense<0.000000e+00> : vector<16x16xf32>
    %25 = tpu.matmul %24, %23, %cst_21 {dimension_numbers = #tpu.dot_dimension_numbers<[1], [1], [0], [0], [0, 0, 1, 0], [], []>} : vector<16x8xf32>, vector<16x8xf32>, vector<16x16xf32> -> vector<16x16xf32>
    %cst_22 = arith.constant 0.000000e+00 : f32
    %26 = vector.broadcast %cst_22 : f32 to vector<16x16xf32>
    %27 = arith.maximumf %25, %26 : vector<16x16xf32>
    %cst_23 = arith.constant dense<0xFF800000> : vector<16xf32>
    %28 = vector.multi_reduction <maximumf>, %27, %cst_23 [1] : vector<16x16xf32> to vector<16xf32>
    %29 = vector.shape_cast %28 : vector<16xf32> to vector<16x1xf32>
    %30 = vector.broadcast %29 : vector<16x1xf32> to vector<16x16xf32>
    %31 = arith.subf %27, %30 : vector<16x16xf32>
    %32 = math.exp %31 : vector<16x16xf32>
    %cst_24 = arith.constant dense<0.000000e+00> : vector<16xf32>
    %33 = vector.multi_reduction <add>, %32, %cst_24 [1] : vector<16x16xf32> to vector<16xf32>
    %34 = vector.shape_cast %33 : vector<16xf32> to vector<16x1xf32>
    %35 = vector.broadcast %34 : vector<16x1xf32> to vector<16x16xf32>
    %36 = arith.divf %32, %35 : vector<16x16xf32>
    %37 = arith.truncf %36 : vector<16x16xf32> to vector<16x16xbf16>
    %c0_25 = arith.constant 0 : index
    %c0_26 = arith.constant 0 : index
    %38 = vector.load %arg11[%c0_25, %c0_26] : memref<16x16xbf16, #tpu.memory_space<vmem>>, vector<16x16xbf16>
    tpu.vector_store %arg11[%c0_25, %c0_26], %37 {strides = array<i32>} : memref<16x16xbf16, #tpu.memory_space<vmem>>, vector<16x16xbf16>,
    %39 = tpu.concatenate %22, %23 in 1 : vector<16x8xf32>, vector<16x8xf32> -> vector<16x16xf32>
    %c0_27 = arith.constant 0 : index
    %c0_28 = arith.constant 0 : index
    %40 = vector.load %arg9[%c0_27, %c0_28] : memref<16x96xf32, #tpu.memory_space<vmem>>, vector<16x96xf32>
    %cst_29 = arith.constant dense<0.000000e+00> : vector<16x96xf32>
    %41 = tpu.matmul %39, %40, %cst_29 {dimension_numbers = #tpu.dot_dimension_numbers<[1], [0], [0], [1], [0, 0, 1, 1], [], []>} : vector<16x16xf32>, vector<16x96xf32>, vector<16x96xf32> -> vector<16x96xf32>
    %42 = vector.extract_strided_slice %41 {offsets = [0, 0], sizes = [16, 8], strides = [1, 1]} : vector<16x96xf32> to vector<16x8xf32>
    %c0_30 = arith.constant 0 : index
    %c0_31 = arith.constant 0 : index
    %c0_32 = arith.constant 0 : index
    %43 = vector.load %arg12[%c0_30, %c0_31, %c0_32] : memref<12x16x8xf32, #tpu.memory_space<vmem>>, vector<1x16x8xf32>
    %44 = vector.shape_cast %43 : vector<1x16x8xf32> to vector<16x8xf32>
    %45 = vector.shape_cast %42 : vector<16x8xf32> to vector<1x16x8xf32>
    tpu.vector_store %arg12[%c0_30, %c0_31, %c0_32], %45 {strides = array<i32>} : memref<12x16x8xf32, #tpu.memory_space<vmem>>, vector<1x16x8xf32>,
    %46 = vector.extract_strided_slice %41 {offsets = [0, 8], sizes = [16, 8], strides = [1, 1]} : vector<16x96xf32> to vector<16x8xf32>
    %c1 = arith.constant 1 : index
    %c0_33 = arith.constant 0 : index
    %c0_34 = arith.constant 0 : index
    %47 = vector.load %arg12[%c1, %c0_33, %c0_34] : memref<12x16x8xf32, #tpu.memory_space<vmem>>, vector<1x16x8xf32>
    %48 = vector.shape_cast %47 : vector<1x16x8xf32> to vector<16x8xf32>
    %49 = vector.shape_cast %46 : vector<16x8xf32> to vector<1x16x8xf32>
    tpu.vector_store %arg12[%c1, %c0_33, %c0_34], %49 {strides = array<i32>} : memref<12x16x8xf32, #tpu.memory_space<vmem>>, vector<1x16x8xf32>,
    %50 = vector.extract_strided_slice %41 {offsets = [0, 16], sizes = [16, 8], strides = [1, 1]} : vector<16x96xf32> to vector<16x8xf32>
    %c2 = arith.constant 2 : index
    %c0_35 = arith.constant 0 : index
    %c0_36 = arith.constant 0 : index
    %51 = vector.load %arg12[%c2, %c0_35, %c0_36] : memref<12x16x8xf32, #tpu.memory_space<vmem>>, vector<1x16x8xf32>
    %52 = vector.shape_cast %51 : vector<1x16x8xf32> to vector<16x8xf32>
    %53 = vector.shape_cast %50 : vector<16x8xf32> to vector<1x16x8xf32>
    tpu.vector_store %arg12[%c2, %c0_35, %c0_36], %53 {strides = array<i32>} : memref<12x16x8xf32, #tpu.memory_space<vmem>>, vector<1x16x8xf32>,
    %54 = vector.extract_strided_slice %41 {offsets = [0, 24], sizes = [16, 8], strides = [1, 1]} : vector<16x96xf32> to vector<16x8xf32>
    %c3 = arith.constant 3 : index
    %c0_37 = arith.constant 0 : index
    %c0_38 = arith.constant 0 : index
    %55 = vector.load %arg12[%c3, %c0_37, %c0_38] : memref<12x16x8xf32, #tpu.memory_space<vmem>>, vector<1x16x8xf32>
    %56 = vector.shape_cast %55 : vector<1x16x8xf32> to vector<16x8xf32>
    %57 = vector.shape_cast %54 : vector<16x8xf32> to vector<1x16x8xf32>
    tpu.vector_store %arg12[%c3, %c0_37, %c0_38], %57 {strides = array<i32>} : memref<12x16x8xf32, #tpu.memory_space<vmem>>, vector<1x16x8xf32>,
    %58 = vector.extract_strided_slice %41 {offsets = [0, 32], sizes = [16, 8], strides = [1, 1]} : vector<16x96xf32> to vector<16x8xf32>
    %c4 = arith.constant 4 : index
    %c0_39 = arith.constant 0 : index
    %c0_40 = arith.constant 0 : index
    %59 = vector.load %arg12[%c4, %c0_39, %c0_40] : memref<12x16x8xf32, #tpu.memory_space<vmem>>, vector<1x16x8xf32>
    %60 = vector.shape_cast %59 : vector<1x16x8xf32> to vector<16x8xf32>
    %61 = vector.shape_cast %58 : vector<16x8xf32> to vector<1x16x8xf32>
    tpu.vector_store %arg12[%c4, %c0_39, %c0_40], %61 {strides = array<i32>} : memref<12x16x8xf32, #tpu.memory_space<vmem>>, vector<1x16x8xf32>,
    %62 = vector.extract_strided_slice %41 {offsets = [0, 40], sizes = [16, 8], strides = [1, 1]} : vector<16x96xf32> to vector<16x8xf32>
    %c5 = arith.constant 5 : index
    %c0_41 = arith.constant 0 : index
    %c0_42 = arith.constant 0 : index
    %63 = vector.load %arg12[%c5, %c0_41, %c0_42] : memref<12x16x8xf32, #tpu.memory_space<vmem>>, vector<1x16x8xf32>
    %64 = vector.shape_cast %63 : vector<1x16x8xf32> to vector<16x8xf32>
    %65 = vector.shape_cast %62 : vector<16x8xf32> to vector<1x16x8xf32>
    tpu.vector_store %arg12[%c5, %c0_41, %c0_42], %65 {strides = array<i32>} : memref<12x16x8xf32, #tpu.memory_space<vmem>>, vector<1x16x8xf32>,
    %66 = vector.extract_strided_slice %41 {offsets = [0, 48], sizes = [16, 8], strides = [1, 1]} : vector<16x96xf32> to vector<16x8xf32>
    %c6 = arith.constant 6 : index
    %c0_43 = arith.constant 0 : index
    %c0_44 = arith.constant 0 : index
    %67 = vector.load %arg12[%c6, %c0_43, %c0_44] : memref<12x16x8xf32, #tpu.memory_space<vmem>>, vector<1x16x8xf32>
    %68 = vector.shape_cast %67 : vector<1x16x8xf32> to vector<16x8xf32>
    %69 = vector.shape_cast %66 : vector<16x8xf32> to vector<1x16x8xf32>
    tpu.vector_store %arg12[%c6, %c0_43, %c0_44], %69 {strides = array<i32>} : memref<12x16x8xf32, #tpu.memory_space<vmem>>, vector<1x16x8xf32>,
    %70 = vector.extract_strided_slice %41 {offsets = [0, 56], sizes = [16, 8], strides = [1, 1]} : vector<16x96xf32> to vector<16x8xf32>
    %c7 = arith.constant 7 : index
    %c0_45 = arith.constant 0 : index
    %c0_46 = arith.constant 0 : index
    %71 = vector.load %arg12[%c7, %c0_45, %c0_46] : memref<12x16x8xf32, #tpu.memory_space<vmem>>, vector<1x16x8xf32>
    %72 = vector.shape_cast %71 : vector<1x16x8xf32> to vector<16x8xf32>
    %73 = vector.shape_cast %70 : vector<16x8xf32> to vector<1x16x8xf32>
    tpu.vector_store %arg12[%c7, %c0_45, %c0_46], %73 {strides = array<i32>} : memref<12x16x8xf32, #tpu.memory_space<vmem>>, vector<1x16x8xf32>,
    %74 = vector.extract_strided_slice %41 {offsets = [0, 64], sizes = [16, 8], strides = [1, 1]} : vector<16x96xf32> to vector<16x8xf32>
    %c8 = arith.constant 8 : index
    %c0_47 = arith.constant 0 : index
    %c0_48 = arith.constant 0 : index
    %75 = vector.load %arg12[%c8, %c0_47, %c0_48] : memref<12x16x8xf32, #tpu.memory_space<vmem>>, vector<1x16x8xf32>
    %76 = vector.shape_cast %75 : vector<1x16x8xf32> to vector<16x8xf32>
    %77 = vector.shape_cast %74 : vector<16x8xf32> to vector<1x16x8xf32>
    tpu.vector_store %arg12[%c8, %c0_47, %c0_48], %77 {strides = array<i32>} : memref<12x16x8xf32, #tpu.memory_space<vmem>>, vector<1x16x8xf32>,
    %78 = vector.extract_strided_slice %41 {offsets = [0, 72], sizes = [16, 8], strides = [1, 1]} : vector<16x96xf32> to vector<16x8xf32>
    %c9 = arith.constant 9 : index
    %c0_49 = arith.constant 0 : index
    %c0_50 = arith.constant 0 : index
    %79 = vector.load %arg12[%c9, %c0_49, %c0_50] : memref<12x16x8xf32, #tpu.memory_space<vmem>>, vector<1x16x8xf32>
    %80 = vector.shape_cast %79 : vector<1x16x8xf32> to vector<16x8xf32>
    %81 = vector.shape_cast %78 : vector<16x8xf32> to vector<1x16x8xf32>
    tpu.vector_store %arg12[%c9, %c0_49, %c0_50], %81 {strides = array<i32>} : memref<12x16x8xf32, #tpu.memory_space<vmem>>, vector<1x16x8xf32>,
    %82 = vector.extract_strided_slice %41 {offsets = [0, 80], sizes = [16, 8], strides = [1, 1]} : vector<16x96xf32> to vector<16x8xf32>
    %c10 = arith.constant 10 : index
    %c0_51 = arith.constant 0 : index
    %c0_52 = arith.constant 0 : index
    %83 = vector.load %arg12[%c10, %c0_51, %c0_52] : memref<12x16x8xf32, #tpu.memory_space<vmem>>, vector<1x16x8xf32>
    %84 = vector.shape_cast %83 : vector<1x16x8xf32> to vector<16x8xf32>
    %85 = vector.shape_cast %82 : vector<16x8xf32> to vector<1x16x8xf32>
    tpu.vector_store %arg12[%c10, %c0_51, %c0_52], %85 {strides = array<i32>} : memref<12x16x8xf32, #tpu.memory_space<vmem>>, vector<1x16x8xf32>,
    %86 = vector.extract_strided_slice %41 {offsets = [0, 88], sizes = [16, 8], strides = [1, 1]} : vector<16x96xf32> to vector<16x8xf32>
    %c11 = arith.constant 11 : index
    %c0_53 = arith.constant 0 : index
    %c0_54 = arith.constant 0 : index
    %87 = vector.load %arg12[%c11, %c0_53, %c0_54] : memref<12x16x8xf32, #tpu.memory_space<vmem>>, vector<1x16x8xf32>
    %88 = vector.shape_cast %87 : vector<1x16x8xf32> to vector<16x8xf32>
    %89 = vector.shape_cast %86 : vector<16x8xf32> to vector<1x16x8xf32>
    tpu.vector_store %arg12[%c11, %c0_53, %c0_54], %89 {strides = array<i32>} : memref<12x16x8xf32, #tpu.memory_space<vmem>>, vector<1x16x8xf32>,
    %c0_55 = arith.constant 0 : index
    %c0_56 = arith.constant 0 : index
    %90 = vector.load %arg10[%c0_55, %c0_56] : memref<16x8xf32, #tpu.memory_space<vmem>>, vector<16x8xf32>
    %cst_57 = arith.constant dense<0.000000e+00> : vector<16x8xf32>
    %91 = tpu.matmul %39, %90, %cst_57 {dimension_numbers = #tpu.dot_dimension_numbers<[1], [0], [0], [1], [0, 0, 1, 1], [], []>} : vector<16x16xf32>, vector<16x8xf32>, vector<16x8xf32> -> vector<16x8xf32>
    %c0_58 = arith.constant 0 : index
    %c0_59 = arith.constant 0 : index
    %92 = vector.load %arg13[%c0_58, %c0_59] : memref<16x8xf32, #tpu.memory_space<vmem>>, vector<16x8xf32>
    tpu.vector_store %arg13[%c0_58, %c0_59], %91 {strides = array<i32>} : memref<16x8xf32, #tpu.memory_space<vmem>>, vector<16x8xf32>,
    return
  }
}

</mosaic_0001>

<bundles_post_ra>
// kernel: tpu_custom_call.1
= control target key start
LH: loop header
LB: loop body
LE: loop exit
PB: predicated region body
PF: predicated region fallthrough
CT: control target
= control target key end

     0   :  { %s1013_s0 = inlined_call_operand.hbm [shape: f32[4,16,128], index: 0, kind: input, shape index: {}]   ;;  %s1014_s1 = inlined_call_operand.vmem [shape: f32[16,8], index: 1, kind: input, shape index: {}]   ;;  %s1015_s2 = inlined_call_operand.vmem [shape: f32[16,8], index: 2, kind: input, shape index: {}]   ;;  %s1016_s3 = inlined_call_operand.vmem [shape: f32[1,128], index: 3, kind: input, shape index: {}]   ;;  %s1017_s4 = inlined_call_operand.<no memory space> [shape: f32[1,1], index: 4, kind: input, shape index: {}]   ;;  %s1018_s5 = inlined_call_operand.vmem [shape: f32[16,8], index: 5, kind: input, shape index: {}]   ;;  %s1019_s6 = inlined_call_operand.vmem [shape: f32[1,8], index: 6, kind: input, shape index: {}]   ;;  %s1020_s7 = inlined_call_operand.vmem [shape: f32[4,8], index: 7, kind: input, shape index: {}]   ;;  %s1021_s8 = inlined_call_operand.vmem [shape: f32[1,8], index: 8, kind: input, shape index: {}]   ;;  %s1022_s9 = inlined_call_operand.vmem [shape: f32[16,96], index: 9, kind: input, shape index: {}]   ;;  %s1023_s10 = inlined_call_operand.vmem [shape: f32[16,8], index: 10, kind: input, shape index: {}]   ;;  %s1024_s11 = inlined_call_operand.hbm [shape: bf16[16,16], index: 11, kind: output, shape index: {0}]   ;;  %s1025_s12 = inlined_call_operand.vmem [shape: f32[12,16,8], index: 12, kind: output, shape index: {1}]   ;;  %s1026_s13 = inlined_call_operand.vmem [shape: f32[16,8], index: 13, kind: output, shape index: {2}]  }
   0x1   :  { %v19_v0 = vstv %s1017_s4 }
   0x2   :  { %20 = vst [vmem:[#allocation2] sm:$0x1] %v19_v0 }
   0x3   :  { %21 = vsyncpa [#allocation4], 0 }
   0x4   :  { %22 = vsyncpa [#allocation5], 0  ;;  %s27_s29 = sshll.u32 %s1013_s0, 4  ;;  %s705_s30 = smov [#allocation3]   ;;  %s28_s29 = int_to_ptr.hbm [resolvable:$true] %s27_s29 }
   0x5   :  { %s29_s14 = sshll.u32 %s705_s30, 4  ;;  %s706_s15 = smov 128   ;;  %s30_s14 = int_to_ptr.vmem [resolvable:$true] %s29_s14 }
   0x6   :  { %s707_s16 = smov 8  }
   0x7   :  { %35 = dma.hbm_to_vmem [thread:$0]  %s28_s29, 1024, %s30_s14, [#allocation4], %s706_s15, %s706_s15, %s707_s16  }
   0x8   :  { %701 = dma.done.wait [#allocation4], 1024  }
   0x9   :  { %702 = vsyncadd [#allocation4], 4294966272  ;;  %v708_v1 = vmov 0   ;;  %v60_v2 = vld [vmem:[#allocation3] sm:$0xff]  ;;  %v621_v3 = vld [vmem:[%s1016_s3] ss:$0 sm:$0xff]  ;;  %v133_v28 = vlaneseq }
   0xa   :  { %620 = vset.pattern.permute.xlu0 %v708_v1  ;;  %v64_v4 = vld [vmem:[#allocation3 + $0x20] sm:$0xff]  ;;  %v62_v5 = vld [vmem:[#allocation3 + $0x10] sm:$0xff]  ;;  %v72_v6 = vmul.f32 %v621_v3, %v60_v2  ;;  %v61_v9 = vld [vmem:[#allocation3 + $0x8] sm:$0xff]  ;;  %vm138_vm0 = vcmask 130112   ;;  %vm149_vm1 = vcmask 1041409   ;;  %vm151_vm2 = vcmask 1042434  }
   0xb   :  { %v76_v7 = vmul.f32 %v621_v3, %v64_v4  ;;  %v74_v8 = vmul.f32 %v621_v3, %v62_v5  ;;  %v65_v10 = vld [vmem:[#allocation3 + $0x28] sm:$0xff]  ;;  %v63_v11 = vld [vmem:[#allocation3 + $0x18] sm:$0xff]  ;;  %v73_v12 = vmul.f32 %v621_v3, %v61_v9  ;;  %v66_v16 = vld [vmem:[#allocation3 + $0x30] sm:$0xff]  ;;  %v134_v37 = vand.u32 127, %v133_v28  ;;  %s710_s3 = smov 120   ;;  %s711_s18 = smov 96  }
   0xc   :  { %80 = vadd.xlane.f32.xlu0 %v72_v6  ;;  %v77_v13 = vmul.f32 %v621_v3, %v65_v10  ;;  %v75_v14 = vmul.f32 %v621_v3, %v63_v11  ;;  %v67_v15 = vld [vmem:[#allocation3 + $0x38] sm:$0xff]  ;;  %v78_v18 = vmul.f32 %v621_v3, %v66_v16  ;;  %v120_v20 = vld [vmem:[%s1018_s5 + $0x8] sm:$0xff]  ;;  %vm153_vm3 = vcmask 1043459   ;;  %s712_s19 = smov 112   ;;  %s714_s24 = smov 80  }
   0xd   :  { %88 = vadd.xlane.f32.xlu2 %v76_v7  ;;  %84 = vadd.xlane.f32.xlu1 %v74_v8  ;;  %v79_v17 = vmul.f32 %v621_v3, %v67_v15  ;;  %v622_v19 = vld [vmem:[#allocation2] ss:$0 sm:$0xff]  ;;  %v136_v41 = vadd.s32 4294967288, %v134_v37  ;;  %vm155_vm4 = vcmask 130048   ;;  %vm220_vm5 = vcmask 1043456   ;;  %v248_v7 = vld [vmem:[%s1015_s2 + $0x8] sm:$0xff] }
   0xe   :  { %v119_v21 = vld [vmem:[%s1018_s5] sm:$0xff]  ;;  %172 = vmatpush.msra.mxu0 %v120_v20  ;;  %vm216_vm6 = vcmask 31744   ;;  %v378_v9 = vld [vmem:[%s1022_s9 + $0x8] sm:$0xff]  ;;  %vm249_vm7 = vcmask 64512   ;;  %s713_s5 = smov 88   ;;  %s715_s25 = smov 72  }
   0xf   :  { %v179_v1 = vld [vmem:[%s1020_s7] sm:$0xf]  ;;  %570 = vmatpush.xpose.msk.msra.mxu3 %vm249_vm7, %v248_v7  ;;  %v512_v16 = vld [vmem:[%s1023_s10 + $0x8] sm:$0xff]  ;;  %s716_s26 = smov 64   ;;  %s718_s30 = smov 48   ;;  %vm366_vm12 = vcmask 125952  }
  0x10   :  { %173 = vmatpush.msra.mxu0 %v119_v21  ;;  %566 = vmatpush.msk.msra.mxu1 %vm220_vm5, %v179_v1  ;;  %v623_v2 = vld [vmem:[%s1019_s6] ss:$0 sm:$0xff]  ;;  %s717_s6 = smov 56   ;;  %s544_s20 = sshll.u32 %s1024_s11, 4  ;;  %s545_s20 = int_to_ptr.hbm [resolvable:$true] %s544_s20 }
  0x11   :  { %v247_v6 = vld [vmem:[%s1015_s2] sm:$0xff]  ;;  %s719_s2 = smov 40   ;;  %s720_s23 = smov [#allocation6]  }
  0x12   :  { %v245_v10 = vld [vmem:[%s1014_s1] sm:$0xff]  ;;  %399 = vmatpush.msrb.mxu1 %v378_v9  ;;  %527 = vmatpush.msrb.mxu0 %v512_v16  ;;  %s542_s7 = sshll.u32 %s720_s23, 4  ;;  %s721_s27 = smov 4   ;;  %s543_s7 = int_to_ptr.vmem [resolvable:$true] %s542_s7 }
  0x13   :  { %571 = vmatpush.xpose.msk.msra.mxu3 %vm249_vm7, %v247_v6 }
  0x14   :  { %82 = vadd.xlane.f32.xlu0 %v73_v12  ;;  %v377_v12 = vld [vmem:[%s1022_s9] sm:$0xff] }
  0x15   :  { %90 = vadd.xlane.f32.xlu2 %v77_v13  ;;  %86 = vadd.xlane.f32.xlu1 %v75_v14  ;;  %v246_v14 = vld [vmem:[%s1014_s1 + $0x8] sm:$0xff] }
  0x16   :  { %400 = vmatpush.msrb.mxu1 %v377_v12 }
  0x1d   :  { %94 = vadd.xlane.f32.xlu2 %v79_v17  ;;  %92 = vadd.xlane.f32.xlu1 %v78_v18  ;;  %v511_v17 = vld [vmem:[%s1023_s10] sm:$0xff] }
  0x1e   :  { %528 = vmatpush.msrb.mxu0 %v511_v17 }
  0x28   :  { %100 = vperm.xlu0 %620, %v622_v19   ;;  %v624_v19 = vld [vmem:[%s1021_s8] ss:$0 sm:$0xff]  ;;  %s709_s8 = smov 104  }
  0x35   :  { %369 = vrot.lane.b32.xlu2 %v247_v6, %s707_s16 }
  0x3d   :  { %371 = vrot.lane.b32.xlu2 %v248_v7, %s707_s16 }
  0x7f   :  { %v81_v22 = vpop.xlane.xlu0 %80 }
  0x80   :  { %v85_v23 = vpop.xlane.xlu1 %84  ;;  %v89_v24 = vpop.xlane.xlu2 %88 }
  0x87   :  { %v83_v25 = vpop.xlane.xlu0 %82 }
  0x88   :  { %v87_v26 = vpop.xlane.xlu1 %86  ;;  %v91_v27 = vpop.xlane.xlu2 %90 }
  0x90   :  { %v93_v33 = vpop.xlane.xlu1 %92  ;;  %v95_v35 = vpop.xlane.xlu2 %94 }
  0x98   :  { %v370_v11 = vpop.permute.xlu2 %369 }
  0x99   :  { %v375_v13 = vsel %vm249_vm7, %v245_v10, %v370_v11 }
  0x9a   :  { %v101_v29 = vpop.permute.xlu0 %100 }
  0x9b   :  { %v103_v30 = vadd.f32 %v101_v29, %v81_v22  ;;  %v104_v31 = vadd.f32 %v101_v29, %v83_v25  ;;  %v105_v32 = vadd.f32 %v101_v29, %v85_v23  ;;  %v106_v34 = vadd.f32 %v101_v29, %v87_v26 }
  0x9c   :  { %v107_v36 = vadd.f32 %v101_v29, %v89_v24  ;;  %v108_v38 = vadd.f32 %v101_v29, %v91_v27  ;;  %v109_v39 = vadd.f32 %v101_v29, %v93_v33  ;;  %v110_v40 = vadd.f32 %v101_v29, %v95_v35 }
  0x9d   :  { %625 = vtanh.f32 %v103_v30 }
  0x9e   :  { %627 = vtanh.f32 %v104_v31 }
  0x9f   :  { %629 = vtanh.f32 %v105_v32 }
  0xa0   :  { %631 = vtanh.f32 %v106_v34  ;;  %v372_v15 = vpop.permute.xlu2 %371 }
  0xa1   :  { %633 = vtanh.f32 %v107_v36  ;;  %v376_v18 = vsel %vm249_vm7, %v246_v14, %v372_v15 }
  0xa2   :  { %635 = vtanh.f32 %v108_v38 }
  0xa3   :  { %v626_v42 = vpop.eup %625  ;;  %637 = vtanh.f32 %v109_v39 }
  0xa4   :  { %v628_v43 = vpop.eup %627  ;;  %639 = vtanh.f32 %v110_v40  ;;  %v135_v44 = vperm.slane %v626_v42, %v134_v37 }
  0xa5   :  { %v630_v45 = vpop.eup %629  ;;  %v137_v46 = vperm.slane %v628_v43, %v136_v41 }
  0xa6   :  { %v632_v47 = vpop.eup %631  ;;  %v140_v48 = vperm.slane %v630_v45, %v134_v37 }
  0xa7   :  { %v634_v49 = vpop.eup %633  ;;  %v139_v50 = vsel %vm138_vm0, %v137_v46, %v135_v44  ;;  %v141_v51 = vperm.slane %v632_v47, %v136_v41 }
  0xa8   :  { %v636_v52 = vpop.eup %635  ;;  %v143_v53 = vperm.slane %v634_v49, %v134_v37 }
  0xa9   :  { %v638_v54 = vpop.eup %637  ;;  %v142_v55 = vsel %vm138_vm0, %v141_v51, %v140_v48  ;;  %v144_v56 = vperm.slane %v636_v52, %v136_v41 }
  0xaa   :  { %v640_v57 = vpop.eup %639  ;;  %v146_v58 = vperm.slane %v638_v54, %v134_v37  ;;  %v150_v59 = vsel %vm149_vm1, %v142_v55, %v139_v50 }
  0xab   :  { %v145_v60 = vsel %vm138_vm0, %v144_v56, %v143_v53  ;;  %v147_v61 = vperm.slane %v640_v57, %v136_v41 }
  0xac   :  { %v152_v62 = vsel %vm151_vm2, %v145_v60, %v150_v59 }
  0xad   :  { %v148_v63 = vsel %vm138_vm0, %v147_v61, %v146_v58 }
  0xae   :  { %v154_v0 = vsel %vm153_vm3, %v148_v63, %v152_v62 }
  0xaf   :  { %565 = vmatmul.msk.f32.vlgmr.msra.gmra.mxu0 %vm155_vm4, %v154_v0 }
  0xb7   :  { %598 = vmatmul.msk.f32.vlgmr.msrb.gmra.mxu0 %vm155_vm4, %v375_v13 }
 0x12c   :  { %v175_v3 = vpop.f32.mrf.mxu0 }
 0x12d   :  { %v176_v4 = vadd.f32 %v623_v2, %v175_v3 }
 0x12f   :  { %641 = vtanh.f32 %v176_v4 }
 0x134   :  { %v530_v25 = vpop.f32.mrf.mxu0 }
 0x135   :  { %v642_v5 = vpop.eup %641  ;;  %536 = vst.msk [vmem:[%s1026_s13] sm:$0xff] %vm249_vm7, %v530_v25 }
 0x136   :  { %184 = vxpose.xlu1.b32.start.end [1/1] (short) (narrow) %v642_v5, 8 }
 0x1da   :  { %v200_v8 = vpop.trf.xlu1 }
 0x1db   :  { %567 = vmatmul.msk.f32.vlgmr.msra.gmra.mxu1 %vm216_vm6, %v200_v8 }
 0x1e3   :  { %574 = vmatmul.msk.f32.vlgmr.msrb.gmra.mxu1 %vm155_vm4, %v375_v13 }
 0x1eb   :  { %575 = vmatmul.msk.f32.gmra.mxu1 %vm155_vm4, %v376_v18 }
 0x258   :  { %v241_v20 = vpop.f32.mrf.mxu1 }
 0x259   :  { %v242_v21 = vadd.f32 %v624_v19, %v241_v20 }
 0x25b   :  { %643 = vtanh.f32 %v242_v21 }
 0x260   :  { %v858_v23 = vpop.f32.mrf.mxu1 }
 0x261   :  { %v644_v22 = vpop.eup %643  ;;  %408 = vst.msk [vmem:[%s1025_s12] sm:$0xff] %vm249_vm7, %v858_v23  ;;  %430 = vrot.lane.b32.xlu2 %v858_v23, %s709_s8  ;;  %412 = vrot.lane.b32.xlu0 %v858_v23, %s710_s3 }
 0x262   :  { %271 = vmatpush.msra.mxu2 %v644_v22 }
 0x263   :  { %568 = vmatmul.msk.f32.vlgmr.msra.gmra.mxu2 %vm249_vm7, %v245_v10 }
 0x264   :  { %600 = vmatpush.msrb.mxu2 %v512_v16 }
 0x266   :  { %601 = vmatpush.msrb.mxu2 %v511_v17 }
 0x268   :  { %v871_v24 = vpop.f32.mrf.mxu1 }
 0x269   :  { %439 = vrot.lane.b32.xlu2 %v858_v23, %s711_s18  ;;  %421 = vrot.lane.b32.xlu0 %v858_v23, %s712_s19  ;;  %409 = vst.msk [vmem:[%s1025_s12 + $0x8] sm:$0xff] %vm249_vm7, %v871_v24 }
 0x26b   :  { %569 = vmatmul.msk.f32.gmra.mxu2 %vm249_vm7, %v246_v14 }
 0x271   :  { %448 = vrot.lane.b32.xlu2 %v858_v23, %s713_s5  ;;  %423 = vrot.lane.b32.xlu0 %v871_v24, %s712_s19 }
 0x273   :  { %599 = vmatmul.msk.f32.vlgmr.msrb.gmra.mxu2 %vm155_vm4, %v376_v18 }
 0x279   :  { %414 = vrot.lane.b32.xlu2 %v871_v24, %s710_s3  ;;  %432 = vrot.lane.b32.xlu0 %v871_v24, %s709_s8 }
 0x281   :  { %457 = vrot.lane.b32.xlu2 %v858_v23, %s714_s24  ;;  %441 = vrot.lane.b32.xlu0 %v871_v24, %s711_s18 }
 0x289   :  { %466 = vrot.lane.b32.xlu2 %v858_v23, %s715_s25 }
 0x291   :  { %475 = vrot.lane.b32.xlu2 %v858_v23, %s716_s26 }
 0x299   :  { %484 = vrot.lane.b32.xlu2 %v858_v23, %s717_s6 }
 0x2bb   :  { %v431_v29 = vpop.permute.xlu2 %430 }
 0x2bc   :  { %580 = vst.msk [vmem:[%s1025_s12 + $0x30] sm:$0xff] %vm249_vm7, %v431_v29 }
 0x2c3   :  { %v440_v30 = vpop.permute.xlu2 %439 }
 0x2c4   :  { %582 = vst.msk [vmem:[%s1025_s12 + $0x40] sm:$0xff] %vm249_vm7, %v440_v30 }
 0x2cb   :  { %v449_v31 = vpop.permute.xlu2 %448 }
 0x2cc   :  { %584 = vst.msk [vmem:[%s1025_s12 + $0x50] sm:$0xff] %vm249_vm7, %v449_v31 }
 0x2d3   :  { %v415_v32 = vpop.permute.xlu2 %414  ;;  %v413_v37 = vpop.permute.xlu0 %412 }
 0x2d4   :  { %577 = vst.msk [vmem:[%s1025_s12 + $0x18] sm:$0xff] %vm249_vm7, %v415_v32 }
 0x2d5   :  { %576 = vst.msk [vmem:[%s1025_s12 + $0x10] sm:$0xff] %vm249_vm7, %v413_v37 }
 0x2db   :  { %v458_v33 = vpop.permute.xlu2 %457  ;;  %v422_v38 = vpop.permute.xlu0 %421 }
 0x2dc   :  { %586 = vst.msk [vmem:[%s1025_s12 + $0x60] sm:$0xff] %vm249_vm7, %v458_v33 }
 0x2dd   :  { %578 = vst.msk [vmem:[%s1025_s12 + $0x20] sm:$0xff] %vm249_vm7, %v422_v38 }
 0x2e3   :  { %v467_v34 = vpop.permute.xlu2 %466  ;;  %v424_v42 = vpop.permute.xlu0 %423 }
 0x2e4   :  { %588 = vst.msk [vmem:[%s1025_s12 + $0x70] sm:$0xff] %vm249_vm7, %v467_v34 }
 0x2e5   :  { %579 = vst.msk [vmem:[%s1025_s12 + $0x28] sm:$0xff] %vm249_vm7, %v424_v42 }
 0x2e6   :  { %v273_v26 = vpop.f32.mrf.mxu2 }
 0x2e7   :  { %572 = vmatmul.msk.f32.vlgmr.msra.gmra.mxu3 %vm249_vm7, %v273_v26 }
 0x2eb   :  { %v476_v35 = vpop.permute.xlu2 %475  ;;  %v433_v46 = vpop.permute.xlu0 %432 }
 0x2ec   :  { %590 = vst.msk [vmem:[%s1025_s12 + $0x80] sm:$0xff] %vm249_vm7, %v476_v35 }
 0x2ed   :  { %581 = vst.msk [vmem:[%s1025_s12 + $0x38] sm:$0xff] %vm249_vm7, %v433_v46 }
 0x2ee   :  { %v276_v27 = vpop.f32.mrf.mxu2 }
 0x2ef   :  { %573 = vmatmul.msk.f32.gmra.mxu3 %vm249_vm7, %v276_v27 }
 0x2f3   :  { %v485_v36 = vpop.permute.xlu2 %484  ;;  %v442_v47 = vpop.permute.xlu0 %441 }
 0x2f4   :  { %592 = vst.msk [vmem:[%s1025_s12 + $0x90] sm:$0xff] %vm249_vm7, %v485_v36 }
 0x2f5   :  { %583 = vst.msk [vmem:[%s1025_s12 + $0x48] sm:$0xff] %vm249_vm7, %v442_v47 }
 0x2f6   :  { %v533_v28 = vpop.f32.mrf.mxu2 }
 0x2f7   :  { %537 = vst.msk [vmem:[%s1026_s13 + $0x8] sm:$0xff] %vm249_vm7, %v533_v28 }
 0x36a   :  { %v308_v39 = vpop.f32.mrf.mxu3 }
 0x36b   :  { %v314_v40 = vmax.f32 %v308_v39, 0.0 }
 0x36d   :  { %v316_v41 = vsel %vm155_vm4, %v314_v40, -inf }
 0x36e   :  { %317 = vmax.xlane.f32.xlu0 %v316_v41 }
 0x372   :  { %v311_v43 = vpop.f32.mrf.mxu3 }
 0x373   :  { %v315_v44 = vmax.f32 %v311_v43, 0.0 }
 0x375   :  { %v319_v45 = vsel %vm155_vm4, %v315_v44, -inf }
 0x376   :  { %320 = vmax.xlane.f32.xlu2 %v319_v45 }
 0x382   :  { %450 = vrot.lane.b32.xlu0 %v871_v24, %s713_s5 }
 0x38a   :  { %459 = vrot.lane.b32.xlu0 %v871_v24, %s714_s24 }
 0x38e   :  { %495 = vrot.lane.b32.xlu2 %v871_v24, %s718_s30 }
 0x392   :  { %468 = vrot.lane.b32.xlu0 %v871_v24, %s715_s25 }
 0x39a   :  { %477 = vrot.lane.b32.xlu0 %v871_v24, %s716_s26 }
 0x3a2   :  { %493 = vrot.lane.b32.xlu0 %v858_v23, %s718_s30 }
 0x3aa   :  { %502 = vrot.lane.b32.xlu0 %v858_v23, %s719_s2 }
 0x3e1   :  { %v318_v48 = vpop.xlane.xlu0 %317 }
 0x3e2   :  { %v322_v49 = vsub.f32 %v314_v40, %v318_v48 }
 0x3e4   :  { %v324_v50 = vmul.f32 1.442695, %v322_v49 }
 0x3e6   :  { %645 = vpow2.f32 %v324_v50 }
 0x3e9   :  { %v321_v51 = vpop.xlane.xlu2 %320 }
 0x3ea   :  { %v323_v52 = vsub.f32 %v315_v44, %v321_v51 }
 0x3ec   :  { %v646_v53 = vpop.eup %645  ;;  %v326_v54 = vmul.f32 1.442695, %v323_v52 }
 0x3ed   :  { %v328_v55 = vsel %vm155_vm4, %v646_v53, 0.0 }
 0x3ee   :  { %647 = vpow2.f32 %v326_v54  ;;  %329 = vadd.xlane.f32.xlu1 %v328_v55 }
 0x3f1   :  { %v496_v56 = vpop.permute.xlu2 %495 }
 0x3f2   :  { %595 = vst.msk [vmem:[%s1025_s12 + $0xa8] sm:$0xff] %vm249_vm7, %v496_v56 }
 0x3f4   :  { %v648_v57 = vpop.eup %647  ;;  %v451_v58 = vpop.permute.xlu0 %450 }
 0x3f5   :  { %585 = vst.msk [vmem:[%s1025_s12 + $0x58] sm:$0xff] %vm249_vm7, %v451_v58  ;;  %v331_v59 = vsel %vm155_vm4, %v648_v57, 0.0 }
 0x3f6   :  { %332 = vadd.xlane.f32.xlu2 %v331_v59 }
 0x3fc   :  { %v460_v60 = vpop.permute.xlu0 %459 }
 0x3fd   :  { %587 = vst.msk [vmem:[%s1025_s12 + $0x68] sm:$0xff] %vm249_vm7, %v460_v60 }
 0x404   :  { %v469_v61 = vpop.permute.xlu0 %468 }
 0x405   :  { %589 = vst.msk [vmem:[%s1025_s12 + $0x78] sm:$0xff] %vm249_vm7, %v469_v61 }
 0x407   :  { %486 = vrot.lane.b32.xlu1 %v871_v24, %s717_s6 }
 0x40c   :  { %v478_v62 = vpop.permute.xlu0 %477 }
 0x40d   :  { %591 = vst.msk [vmem:[%s1025_s12 + $0x88] sm:$0xff] %vm249_vm7, %v478_v62 }
 0x40e   :  { %504 = vrot.lane.b32.xlu2 %v871_v24, %s719_s2 }
 0x414   :  { %v494_v63 = vpop.permute.xlu0 %493 }
 0x415   :  { %594 = vst.msk [vmem:[%s1025_s12 + $0xa0] sm:$0xff] %vm249_vm7, %v494_v63 }
 0x41c   :  { %v503_v0 = vpop.permute.xlu0 %502 }
 0x41d   :  { %596 = vst.msk [vmem:[%s1025_s12 + $0xb0] sm:$0xff] %vm249_vm7, %v503_v0 }
 0x461   :  { %v330_v1 = vpop.xlane.xlu1 %329 }
 0x462   :  { %649 = vrcp.f32 %v330_v1  ;;  %v345_v6 = vand.u32 2147483648, %v330_v1  ;;  %v343_v8 = vand.u32 2147483647, %v330_v1  ;;  %vm339_vm9 = vweird.f32 %v330_v1 }
 0x464   :  { %v346_v11 = vor.u32 1.1754944e-38, %v345_v6  ;;  %vm344_vm11 = vcmp.eq.f32.partialorder %v343_v8, 8.507059e+37 }
 0x468   :  { %v650_v2 = vpop.eup %649 }
 0x469   :  { %v335_v3 = vmul.f32 %v650_v2, %v330_v1  ;;  %v333_v4 = vpop.xlane.xlu2 %332  ;;  %vm340_vm8 = vweird.f32 %v650_v2 }
 0x46a   :  { %651 = vrcp.f32 %v333_v4  ;;  %vm341_vm10 = vmor %vm339_vm9, %vm340_vm8  ;;  %v360_v18 = vand.u32 2147483648, %v333_v4  ;;  %v358_v21 = vand.u32 2147483647, %v333_v4  ;;  %vm354_vm14 = vweird.f32 %v333_v4 }
 0x46b   :  { %v336_v5 = vsub.f32 1.0, %v335_v3 }
 0x46c   :  { %v361_v23 = vor.u32 1.1754944e-38, %v360_v18  ;;  %vm359_vm0 = vcmp.eq.f32.partialorder %v358_v21, 8.507059e+37 }
 0x46d   :  { %v337_v7 = vmul.f32 %v650_v2, %v336_v5 }
 0x46f   :  { %v338_v9 = vadd.f32 %v650_v2, %v337_v7 }
 0x470   :  { %v652_v10 = vpop.eup %651 }
 0x471   :  { %v342_v12 = vsel %vm341_vm10, %v650_v2, %v338_v9  ;;  %v350_v13 = vmul.f32 %v652_v10, %v333_v4  ;;  %v505_v14 = vpop.permute.xlu2 %504  ;;  %vm355_vm13 = vweird.f32 %v652_v10 }
 0x472   :  { %v347_v15 = vsel %vm344_vm11, %v346_v11, %v342_v12  ;;  %597 = vst.msk [vmem:[%s1025_s12 + $0xb8] sm:$0xff] %vm249_vm7, %v505_v14  ;;  %vm356_vm15 = vmor %vm354_vm14, %vm355_vm13 }
 0x473   :  { %v348_v16 = vmul.f32 %v646_v53, %v347_v15  ;;  %v351_v17 = vsub.f32 1.0, %v350_v13 }
 0x475   :  { %v364_v19 = vpack.c.bf16 %v348_v16, %v348_v16  ;;  %v352_v20 = vmul.f32 %v652_v10, %v351_v17 }
 0x477   :  { %v353_v22 = vadd.f32 %v652_v10, %v352_v20  ;;  %367 = vst.msk [vmem:[#allocation6] sm:$0xf] %vm366_vm12, %v364_v19 }
 0x479   :  { %v357_v24 = vsel %vm356_vm15, %v652_v10, %v353_v22  ;;  %v487_v25 = vpop.permute.xlu1 %486 }
 0x47a   :  { %v362_v26 = vsel %vm359_vm0, %v361_v23, %v357_v24  ;;  %593 = vst.msk [vmem:[%s1025_s12 + $0x98] sm:$0xff] %vm249_vm7, %v487_v25 }
 0x47b   :  { %v363_v27 = vmul.f32 %v648_v57, %v362_v26 }
 0x47d   :  { %v365_v28 = vpack.c.bf16 %v363_v27, %v363_v27 }
 0x47f   :  { %368 = vst.msk [vmem:[#allocation6 + $0x4] sm:$0xf] %vm366_vm12, %v365_v28 }
 0x480   :  { %550 = dma.vmem_to_hbm [thread:$0]  %s543_s7, 128, %s545_s20, [#allocation5], %s716_s26, %s716_s26, %s721_s27  }
 0x481   :  { %703 = dma.done.wait [#allocation5], 128  }
 0x482   :  { %704 = vsyncadd [#allocation5], 4294967168 }
 0x483   :  { %563 = vsyncpa [#allocation4], 1 }
 0x484   :  { %564 = vsyncpa [#allocation5], 1 }

</bundles_post_ra>
